<compile_context>
chip_gen: v7x
topology: tpu7x:2x2x1
jax: 0.10.0
libtpu: 0.0.40
codegen_flags: <defaults>
</compile_context>

<pallas_src>
import functools

import jax
import jax.numpy as jnp
from jax.experimental import pallas as pl
from jax.experimental.pallas import tpu as pltpu


def _round_up(x, m):
    return (x + m - 1) // m * m


def _textcnn_kernel(e1_ref, e2_ref, w_ref, bias_ref, mask_ref, dec_w_ref,
                    dec_b_ref, out_ref, *, k_max, lout_pad):
    """One batch tile: fused conv (all widths) + bias + ReLU + masked max-pool + decoder."""
    # Concatenate the two embedding tables on the lane axis (per tile, in VMEM).
    emb = jnp.concatenate([e1_ref[...], e2_ref[...]], axis=-1)   # (TB, L_pad, 2E)

    # im2col / unfold built once per tile: (TB, Lout_pad, k_max * 2E).
    unf = jnp.concatenate(
        [emb[:, tau:tau + lout_pad, :] for tau in range(k_max)], axis=-1)

    # Single lane-dense MXU contraction covering every conv branch at once.
    conv = jax.lax.dot_general(
        unf, w_ref[...], (((2,), (0,)), ((), ())),
        preferred_element_type=jnp.float32)                      # (TB, Lout_pad, C_pad)

    y = jnp.maximum(conv + bias_ref[...][None], 0.0)             # bias + ReLU (f32)
    y = y + mask_ref[...][None]                                  # -1e30 at invalid positions
    feat = jnp.max(y, axis=1)                                    # global max pool -> (TB, C_pad)

    # dropout(p=0.5) is identity at inference time.
    # TODO(synk): training-mode dropout (pltpu.prng_* masking) not implemented.
    logits = jnp.dot(feat, dec_w_ref[...],
                     preferred_element_type=jnp.float32) + dec_b_ref[...]
    out_ref[...] = logits                                        # (TB, 128) lane-dense store


def textcnn_forward(inputs, params, kernel_sizes, *,
                    compute_dtype=jnp.bfloat16, batch_tile=128):
    """inputs: (B, L) int32 token ids. Returns (B, 2) float32 logits."""
    B, L = inputs.shape
    E = params["embedding"].shape[1]
    c_list = [int(b.shape[0]) for b in params["conv_b"]]
    sum_c = sum(c_list)
    n_out = params["dec_w"].shape[0]                    # 2
    k_max, k_min = max(kernel_sizes), min(kernel_sizes)
    assert L >= k_max

    lout_pad = _round_up(L - k_min + 1, 8)              # padded pooled length
    l_pad = _round_up(lout_pad + k_max - 1, 8)          # padded sequence length
    c_pad = _round_up(sum_c, 128)                       # lane-dense channel axis
    out_pad = 128                                       # lane-dense logits

    tb = min(batch_tile, _round_up(B, 8))               # batch tile (sublane aligned)
    b_pad = _round_up(B, tb)

    # --- embeddings: gather the two tables separately (no (B,L,2E) concat in HBM). ---
    # TODO(synk): the gather itself could be fused into the kernel via scalar-prefetch DMA.
    e1 = params["embedding"][inputs].astype(compute_dtype)
    e2 = params["constant_embedding"][inputs].astype(compute_dtype)
    e1 = jnp.pad(e1, ((0, b_pad - B), (0, l_pad - L), (0, 0)))
    e2 = jnp.pad(e2, ((0, b_pad - B), (0, l_pad - L), (0, 0)))

    # --- fuse all conv branches: (k_max, 2E, c_pad) weight, padded with zeros. ---
    w_full = jnp.zeros((k_max, 2 * E, c_pad), jnp.float32)
    bias_full = jnp.zeros((1, c_pad), jnp.float32)
    lout_limits = []
    off = 0
    for w, b, k in zip(params["conv_w"], params["conv_b"], kernel_sizes):
        c = w.shape[0]                                   # torch layout (c, 2E, k)
        wt = jnp.transpose(w.astype(jnp.float32), (2, 1, 0))       # (k, 2E, c)
        w_full = w_full.at[:k, :, off:off + c].set(wt)
        bias_full = bias_full.at[0, off:off + c].set(b.astype(jnp.float32))
        lout_limits += [L - k + 1] * c
        off += c
    lout_limits += [lout_pad] * (c_pad - sum_c)          # padded channels: never masked
    w_fused = w_full.reshape(k_max * 2 * E, c_pad).astype(compute_dtype)

    # -1e30 where a (position, channel) pair lies outside that branch's valid conv range.
    mask = jnp.where(
        jnp.arange(lout_pad)[:, None] < jnp.array(lout_limits, jnp.int32)[None, :],
        0.0, -1e30).astype(jnp.float32)                  # (lout_pad, c_pad)

    # --- padded decoder (lane-dense output columns). ---
    dec_w = jnp.zeros((c_pad, out_pad), jnp.float32).at[:sum_c, :n_out].set(
        jnp.transpose(params["dec_w"]).astype(jnp.float32))
    dec_b = jnp.zeros((1, out_pad), jnp.float32).at[0, :n_out].set(
        params["dec_b"].astype(jnp.float32))

    itemsize = jnp.dtype(compute_dtype).itemsize
    cost = pl.CostEstimate(
        flops=2 * b_pad * lout_pad * (k_max * 2 * E) * c_pad
              + 2 * b_pad * c_pad * out_pad,
        transcendentals=0,
        bytes_accessed=2 * b_pad * l_pad * E * itemsize
                       + k_max * 2 * E * c_pad * itemsize
                       + (lout_pad * c_pad + c_pad * out_pad + c_pad + out_pad) * 4
                       + b_pad * out_pad * 4)

    out = pl.pallas_call(
        functools.partial(_textcnn_kernel, k_max=k_max, lout_pad=lout_pad),
        out_shape=jax.ShapeDtypeStruct((b_pad, out_pad), jnp.float32),
        grid=(b_pad // tb,),
        in_specs=[
            pl.BlockSpec((tb, l_pad, E), lambda i: (i, 0, 0)),        # embedding
            pl.BlockSpec((tb, l_pad, E), lambda i: (i, 0, 0)),        # constant_embedding
            pl.BlockSpec((k_max * 2 * E, c_pad), lambda i: (0, 0)),   # fused conv weight
            pl.BlockSpec((1, c_pad), lambda i: (0, 0)),               # conv bias
            pl.BlockSpec((lout_pad, c_pad), lambda i: (0, 0)),        # validity mask
            pl.BlockSpec((c_pad, out_pad), lambda i: (0, 0)),         # decoder weight
            pl.BlockSpec((1, out_pad), lambda i: (0, 0)),             # decoder bias
        ],
        out_specs=pl.BlockSpec((tb, out_pad), lambda i: (i, 0)),
        compiler_params=pltpu.CompilerParams(
            dimension_semantics=("parallel",),
            vmem_limit_bytes=32 * 1024 * 1024),
        cost_estimate=cost,
    )(e1, e2, w_fused, bias_full, mask, dec_w, dec_b)

    return out[:B, :n_out]


def textcnn_reference(inputs, params, kernel_sizes):
    """Pure-JAX reference mirroring PyTorch semantics (NCL conv)."""
    emb = jnp.concatenate(
        [params["embedding"][inputs], params["constant_embedding"][inputs]],
        axis=-1).astype(jnp.float32)                      # (B, L, 2E)
    x = jnp.transpose(emb, (0, 2, 1))                     # (B, 2E, L)  NCL
    feats = []
    for i, _k in enumerate(kernel_sizes):
        y = jax.lax.conv_general_dilated(
            x, params["conv_w"][i].astype(jnp.float32), (1,), "VALID",
            dimension_numbers=("NCH", "OIH", "NCH"))
        y = y + params["conv_b"][i][None, :, None]
        y = jnp.maximum(y, 0.0)
        feats.append(jnp.max(y, axis=2))                  # global max pool
    enc = jnp.concatenate(feats, axis=1)
    return enc @ params["dec_w"].T + params["dec_b"]


def init_params(key, vocab_size, embed_size, kernel_sizes, num_channels):
    keys = jax.random.split(key, 3 + 2 * len(kernel_sizes))
    params = {
        "embedding": 0.1 * jax.random.normal(keys[0], (vocab_size, embed_size), jnp.float32),
        "constant_embedding": 0.1 * jax.random.normal(keys[1], (vocab_size, embed_size), jnp.float32),
        "conv_w": [],
        "conv_b": [],
    }
    cin = 2 * embed_size
    for i, (c, k) in enumerate(zip(num_channels, kernel_sizes)):
        params["conv_w"].append(
            0.1 * jax.random.normal(keys[2 + 2 * i], (c, cin, k), jnp.float32))
        params["conv_b"].append(
            0.01 * jax.random.normal(keys[3 + 2 * i], (c,), jnp.float32))
    params["dec_w"] = 0.1 * jax.random.normal(keys[-1], (2, sum(num_channels)), jnp.float32)
    params["dec_b"] = jnp.zeros((2,), jnp.float32)
    return params


if __name__ == "__main__":
    vocab_size, embed_size = 50, 16
    kernel_sizes = [3, 4, 5]
    num_channels = [8, 8, 8]
    B, L = 2, 16

    key = jax.random.PRNGKey(0)
    pkey, ikey = jax.random.split(key)
    params = init_params(pkey, vocab_size, embed_size, kernel_sizes, num_channels)
    inputs = jax.random.randint(ikey, (B, L), 0, vocab_size, dtype=jnp.int32)

    ref = jax.block_until_ready(textcnn_reference(inputs, params, kernel_sizes))

    # f32 path: tight check against the pure-JAX reference.
    out_f32 = jax.block_until_ready(
        textcnn_forward(inputs, params, kernel_sizes, compute_dtype=jnp.float32))
    assert out_f32.shape == (B, 2)
    assert jnp.allclose(out_f32, ref, atol=1e-3, rtol=1e-3), (out_f32, ref)

    # bf16 MXU path (default on v6e/v7x/v5e): looser tolerance for input rounding.
    out_bf16 = jax.block_until_ready(textcnn_forward(inputs, params, kernel_sizes))
    assert out_bf16.shape == (B, 2)
    assert jnp.allclose(out_bf16, ref, atol=5e-2, rtol=5e-2), (out_bf16, ref)

    print("KERNEL_OK")
</pallas_src>

<mosaic_0001>
module attributes {stable_mosaic.version = 11 : i64} {
  func.func @_textcnn_kernel(%arg0: i32, %arg1: memref<8x24x16xf32, #tpu.memory_space<vmem>>, %arg2: memref<8x24x16xf32, #tpu.memory_space<vmem>>, %arg3: memref<160x128xf32, #tpu.memory_space<vmem>>, %arg4: memref<1x128xf32, #tpu.memory_space<vmem>>, %arg5: memref<16x128xf32, #tpu.memory_space<vmem>>, %arg6: memref<128x128xf32, #tpu.memory_space<vmem>>, %arg7: memref<1x128xf32, #tpu.memory_space<vmem>>, %arg8: memref<8x128xf32, #tpu.memory_space<vmem>>) attributes {dimension_semantics = [#tpu.dimension_semantics<parallel>], iteration_bounds = array<i64: 1>, scalar_prefetch = 0 : i64, scratch_operands = 0 : i64, tpu.core_type = #tpu.core_type<tc>, window_params = [{transform_indices = @transform_0, window_bounds = array<i64: 8, 24, 16>}, {transform_indices = @transform_1, window_bounds = array<i64: 8, 24, 16>}, {pipeline_mode = #tpu.pipeline_mode<synchronous>, transform_indices = @transform_2, window_bounds = array<i64: 160, 128>}, {pipeline_mode = #tpu.pipeline_mode<synchronous>, transform_indices = @transform_3, window_bounds = array<i64: 1, 128>}, {pipeline_mode = #tpu.pipeline_mode<synchronous>, transform_indices = @transform_4, window_bounds = array<i64: 16, 128>}, {pipeline_mode = #tpu.pipeline_mode<synchronous>, transform_indices = @transform_5, window_bounds = array<i64: 128, 128>}, {pipeline_mode = #tpu.pipeline_mode<synchronous>, transform_indices = @transform_6, window_bounds = array<i64: 1, 128>}, {transform_indices = @transform_7, window_bounds = array<i64: 8, 128>}]} {
    %c0 = arith.constant 0 : index
    %c0_0 = arith.constant 0 : index
    %c0_1 = arith.constant 0 : index
    %0 = vector.load %arg1[%c0, %c0_0, %c0_1] : memref<8x24x16xf32, #tpu.memory_space<vmem>>, vector<8x24x16xf32>
    %c0_2 = arith.constant 0 : index
    %c0_3 = arith.constant 0 : index
    %c0_4 = arith.constant 0 : index
    %1 = vector.load %arg2[%c0_2, %c0_3, %c0_4] : memref<8x24x16xf32, #tpu.memory_space<vmem>>, vector<8x24x16xf32>
    %2 = tpu.concatenate %0, %1 in 2 : vector<8x24x16xf32>, vector<8x24x16xf32> -> vector<8x24x32xf32>
    %3 = vector.extract_strided_slice %2 {offsets = [0, 0, 0], sizes = [8, 16, 32], strides = [1, 1, 1]} : vector<8x24x32xf32> to vector<8x16x32xf32>
    %4 = vector.extract_strided_slice %2 {offsets = [0, 1, 0], sizes = [8, 16, 32], strides = [1, 1, 1]} : vector<8x24x32xf32> to vector<8x16x32xf32>
    %5 = vector.extract_strided_slice %2 {offsets = [0, 2, 0], sizes = [8, 16, 32], strides = [1, 1, 1]} : vector<8x24x32xf32> to vector<8x16x32xf32>
    %6 = vector.extract_strided_slice %2 {offsets = [0, 3, 0], sizes = [8, 16, 32], strides = [1, 1, 1]} : vector<8x24x32xf32> to vector<8x16x32xf32>
    %7 = vector.extract_strided_slice %2 {offsets = [0, 4, 0], sizes = [8, 16, 32], strides = [1, 1, 1]} : vector<8x24x32xf32> to vector<8x16x32xf32>
    %8 = tpu.concatenate %3, %4, %5, %6, %7 in 2 : vector<8x16x32xf32>, vector<8x16x32xf32>, vector<8x16x32xf32>, vector<8x16x32xf32>, vector<8x16x32xf32> -> vector<8x16x160xf32>
    %c0_5 = arith.constant 0 : index
    %c0_6 = arith.constant 0 : index
    %9 = vector.load %arg3[%c0_5, %c0_6] : memref<160x128xf32, #tpu.memory_space<vmem>>, vector<160x128xf32>
    %cst = arith.constant dense<0.000000e+00> : vector<8x16x128xf32>
    %10 = tpu.matmul %8, %9, %cst {dimension_numbers = #tpu.dot_dimension_numbers<[2], [0], [0, 1], [1], [0, 0, 0, 1, 1, 1], [], []>} : vector<8x16x160xf32>, vector<160x128xf32>, vector<8x16x128xf32> -> vector<8x16x128xf32>
    %c0_7 = arith.constant 0 : index
    %c0_8 = arith.constant 0 : index
    %11 = vector.load %arg4[%c0_7, %c0_8] : memref<1x128xf32, #tpu.memory_space<vmem>>, vector<1x128xf32>
    %12 = vector.shape_cast %11 : vector<1x128xf32> to vector<1x1x128xf32>
    %13 = vector.broadcast %12 : vector<1x1x128xf32> to vector<8x16x128xf32>
    %14 = arith.addf %10, %13 : vector<8x16x128xf32>
    %cst_9 = arith.constant 0.000000e+00 : f32
    %15 = vector.broadcast %cst_9 : f32 to vector<8x16x128xf32>
    %16 = arith.maximumf %14, %15 : vector<8x16x128xf32>
    %c0_10 = arith.constant 0 : index
    %c0_11 = arith.constant 0 : index
    %17 = vector.load %arg5[%c0_10, %c0_11] : memref<16x128xf32, #tpu.memory_space<vmem>>, vector<16x128xf32>
    %18 = vector.shape_cast %17 : vector<16x128xf32> to vector<1x16x128xf32>
    %19 = vector.broadcast %18 : vector<1x16x128xf32> to vector<8x16x128xf32>
    %20 = arith.addf %16, %19 : vector<8x16x128xf32>
    %cst_12 = arith.constant dense<0xFF800000> : vector<8x128xf32>
    %21 = vector.multi_reduction <maximumf>, %20, %cst_12 [1] : vector<8x16x128xf32> to vector<8x128xf32>
    %c0_13 = arith.constant 0 : index
    %c0_14 = arith.constant 0 : index
    %22 = vector.load %arg6[%c0_13, %c0_14] : memref<128x128xf32, #tpu.memory_space<vmem>>, vector<128x128xf32>
    %cst_15 = arith.constant dense<0.000000e+00> : vector<8x128xf32>
    %23 = tpu.matmul %21, %22, %cst_15 {dimension_numbers = #tpu.dot_dimension_numbers<[1], [0], [0], [1], [0, 0, 1, 1], [], []>} : vector<8x128xf32>, vector<128x128xf32>, vector<8x128xf32> -> vector<8x128xf32>
    %c0_16 = arith.constant 0 : index
    %c0_17 = arith.constant 0 : index
    %24 = vector.load %arg7[%c0_16, %c0_17] : memref<1x128xf32, #tpu.memory_space<vmem>>, vector<1x128xf32>
    %25 = vector.broadcast %24 : vector<1x128xf32> to vector<8x128xf32>
    %26 = arith.addf %23, %25 : vector<8x128xf32>
    %c0_18 = arith.constant 0 : index
    %c0_19 = arith.constant 0 : index
    %27 = vector.load %arg8[%c0_18, %c0_19] : memref<8x128xf32, #tpu.memory_space<vmem>>, vector<8x128xf32>
    tpu.vector_store %arg8[%c0_18, %c0_19], %26 {strides = array<i32>} : memref<8x128xf32, #tpu.memory_space<vmem>>, vector<8x128xf32>,
    return
  }
  func.func @transform_0(%arg0: i32) -> (i32, i32, i32) {
    %c0_i32 = arith.constant 0 : i32
    %c0_i32_0 = arith.constant 0 : i32
    %c0_i32_1 = arith.constant 0 : i32
    return %arg0, %c0_i32, %c0_i32_0 : i32, i32, i32
  }
  func.func @transform_1(%arg0: i32) -> (i32, i32, i32) {
    %c0_i32 = arith.constant 0 : i32
    %c0_i32_0 = arith.constant 0 : i32
    %c0_i32_1 = arith.constant 0 : i32
    return %arg0, %c0_i32, %c0_i32_0 : i32, i32, i32
  }
  func.func @transform_2(%arg0: i32) -> (i32, i32) {
    %c0_i32 = arith.constant 0 : i32
    %c0_i32_0 = arith.constant 0 : i32
    %c0_i32_1 = arith.constant 0 : i32
    return %c0_i32, %c0_i32_0 : i32, i32
  }
  func.func @transform_3(%arg0: i32) -> (i32, i32) {
    %c0_i32 = arith.constant 0 : i32
    %c0_i32_0 = arith.constant 0 : i32
    %c0_i32_1 = arith.constant 0 : i32
    return %c0_i32, %c0_i32_0 : i32, i32
  }
  func.func @transform_4(%arg0: i32) -> (i32, i32) {
    %c0_i32 = arith.constant 0 : i32
    %c0_i32_0 = arith.constant 0 : i32
    %c0_i32_1 = arith.constant 0 : i32
    return %c0_i32, %c0_i32_0 : i32, i32
  }
  func.func @transform_5(%arg0: i32) -> (i32, i32) {
    %c0_i32 = arith.constant 0 : i32
    %c0_i32_0 = arith.constant 0 : i32
    %c0_i32_1 = arith.constant 0 : i32
    return %c0_i32, %c0_i32_0 : i32, i32
  }
  func.func @transform_6(%arg0: i32) -> (i32, i32) {
    %c0_i32 = arith.constant 0 : i32
    %c0_i32_0 = arith.constant 0 : i32
    %c0_i32_1 = arith.constant 0 : i32
    return %c0_i32, %c0_i32_0 : i32, i32
  }
  func.func @transform_7(%arg0: i32) -> (i32, i32) {
    %c0_i32 = arith.constant 0 : i32
    %c0_i32_0 = arith.constant 0 : i32
    return %arg0, %c0_i32 : i32, i32
  }
}

</mosaic_0001>

<bundles_post_ra>
// kernel: tpu_custom_call.1
= control target key start
LH: loop header
LB: loop body
LE: loop exit
PB: predicated region body
PF: predicated region fallthrough
CT: control target
= control target key end

     0   :  { %s1265_s28 = smov 16   ;;  %s2052_s0 = inlined_call_operand.vmem [shape: f32[8,24,16], index: 0, kind: input, shape index: {}]   ;;  %s2053_s1 = inlined_call_operand.vmem [shape: f32[8,24,16], index: 1, kind: input, shape index: {}]   ;;  %s2054_s2 = inlined_call_operand.vmem [shape: f32[160,128], index: 2, kind: input, shape index: {}]   ;;  %s2055_s3 = inlined_call_operand.vmem [shape: f32[1,128], index: 3, kind: input, shape index: {}]   ;;  %s2056_s4 = inlined_call_operand.vmem [shape: f32[16,128], index: 4, kind: input, shape index: {}]   ;;  %s2057_s5 = inlined_call_operand.vmem [shape: f32[128,128], index: 5, kind: input, shape index: {}]   ;;  %s2058_s6 = inlined_call_operand.vmem [shape: f32[1,128], index: 6, kind: input, shape index: {}]   ;;  %s2059_s7 = inlined_call_operand.hbm [shape: f32[8,128], index: 7, kind: output, shape index: {}]  }
   0x1   :  { %v53_v0 = vld [vmem:[%s2053_s1 + $0x10] sm:$0xff]  ;;  %v51_v1 = vld [vmem:[%s2053_s1] sm:$0xff]  ;;  %v54_v2 = vld [vmem:[%s2053_s1 + $0x18] sm:$0xff] }
   0x2   :  { %103 = vrot.lane.b32.xlu1 %v53_v0, %s1265_s28  ;;  %99 = vrot.lane.b32.xlu0 %v51_v1, %s1265_s28  ;;  %v52_v3 = vld [vmem:[%s2053_s1 + $0x8] sm:$0xff]  ;;  %v55_v5 = vld [vmem:[%s2053_s1 + $0x20] sm:$0xff] }
   0x3   :  { %v56_v4 = vld [vmem:[%s2053_s1 + $0x28] sm:$0xff]  ;;  %v58_v6 = vld [vmem:[%s2053_s1 + $0x38] sm:$0xff]  ;;  %v57_v7 = vld [vmem:[%s2053_s1 + $0x30] sm:$0xff] }
   0x4   :  { %v60_v8 = vld [vmem:[%s2053_s1 + $0x48] sm:$0xff]  ;;  %v59_v9 = vld [vmem:[%s2053_s1 + $0x40] sm:$0xff] }
   0x6   :  { %105 = vrot.lane.b32.xlu1 %v54_v2, %s1265_s28  ;;  %101 = vrot.lane.b32.xlu0 %v52_v3, %s1265_s28 }
   0xa   :  { %109 = vrot.lane.b32.xlu1 %v56_v4, %s1265_s28  ;;  %107 = vrot.lane.b32.xlu0 %v55_v5, %s1265_s28 }
   0xe   :  { %113 = vrot.lane.b32.xlu1 %v58_v6, %s1265_s28  ;;  %111 = vrot.lane.b32.xlu0 %v57_v7, %s1265_s28 }
   0xf   :  { %12 = vsyncpa [#allocation3], 0  ;;  %v62_v10 = vld [vmem:[%s2053_s1 + $0x58] sm:$0xff]  ;;  %v61_v11 = vld [vmem:[%s2053_s1 + $0x50] sm:$0xff]  ;;  %v1266_v27 = vmov 0.0|0.0   ;;  %vm171_vm0 = vcmask 130048  }
  0x10   :  { %v64_v12 = vld [vmem:[%s2053_s1 + $0x68] sm:$0xff]  ;;  %v63_v13 = vld [vmem:[%s2053_s1 + $0x60] sm:$0xff]  ;;  %v66_v14 = vld [vmem:[%s2053_s1 + $0x78] sm:$0xff]  ;;  %1074 = vmatprep.subr.bf16.mxu0 %v1266_v27  ;;  %1104 = vmatprep.subr.bf16.mxu1 %v1266_v27  ;;  %vm487_vm1 = vcmask 1043456   ;;  %vm528_vm2 = vcmask 261120   ;;  %vm309_vm3 = vcmask 1045504  }
  0x11   :  { %v65_v15 = vld [vmem:[%s2053_s1 + $0x70] sm:$0xff]  ;;  %v68_v16 = vld [vmem:[%s2053_s1 + $0x88] sm:$0xff]  ;;  %v67_v17 = vld [vmem:[%s2053_s1 + $0x80] sm:$0xff]  ;;  %vm220_vm4 = vcmask 1046528   ;;  %vm398_vm5 = vcmask 1044480   ;;  %s1267_s12 = smov 64  }
  0x12   :  { %117 = vrot.lane.b32.xlu1 %v60_v8, %s1265_s28  ;;  %115 = vrot.lane.b32.xlu0 %v59_v9, %s1265_s28  ;;  %v69_v18 = vld [vmem:[%s2053_s1 + $0x90] sm:$0xff]  ;;  %v70_v19 = vld [vmem:[%s2053_s1 + $0x98] sm:$0xff]  ;;  %s1269_s17 = smov 96   ;;  %vm545_vm6 = vcmask 523264   ;;  %vm562_vm7 = vcmask 785408   ;;  %vm1270_vm8 = vmmov 0  }
  0x13   :  { %v71_v20 = vld [vmem:[%s2053_s1 + $0xa0] sm:$0xff]  ;;  %v72_v21 = vld [vmem:[%s2053_s1 + $0xa8] sm:$0xff]  ;;  %v73_v22 = vld [vmem:[%s2053_s1 + $0xb0] sm:$0xff]  ;;  %vm904_vm9 = vcmask 1041409   ;;  %vm906_vm10 = vcmask 1042434   ;;  %vm908_vm11 = vcmask 1043459  }
  0x14   :  { %v74_v23 = vld [vmem:[%s2053_s1 + $0xb8] sm:$0xff]  ;;  %v579_v24 = vld [vmem:[%s2054_s2] sm:$0xff]  ;;  %v580_v25 = vld [vmem:[%s2054_s2 + $0x8] sm:$0xff]  ;;  %vm910_vm12 = vcmask 1044484   ;;  %vm912_vm13 = vcmask 1045509   ;;  %vm914_vm14 = vcmask 1046534  }
  0x15   :  { %v581_v26 = vld [vmem:[%s2054_s2 + $0x10] sm:$0xff]  ;;  %v1075_v28 = vpack.c.bf16 %v580_v25, %v579_v24  ;;  %v582_v29 = vld [vmem:[%s2054_s2 + $0x18] sm:$0xff]  ;;  %v583_v31 = vld [vmem:[%s2054_s2 + $0x20] sm:$0xff]  ;;  %vm916_vm15 = vcmask 1047559   ;;  %s1272_s9 = smov [#allocation2]  }
  0x16   :  { %121 = vrot.lane.b32.xlu1 %v62_v10, %s1265_s28  ;;  %119 = vrot.lane.b32.xlu0 %v61_v11, %s1265_s28  ;;  %v1078_v30 = vpack.c.bf16 %v582_v29, %v581_v26  ;;  %v584_v32 = vld [vmem:[%s2054_s2 + $0x28] sm:$0xff]  ;;  %v585_v34 = vld [vmem:[%s2054_s2 + $0x30] sm:$0xff] }
  0x17   :  { %1076 = vmatpush1.bf16.msra.mxu0 %v1075_v28  ;;  %v1081_v33 = vpack.c.bf16 %v584_v32, %v583_v31  ;;  %v586_v35 = vld [vmem:[%s2054_s2 + $0x38] sm:$0xff]  ;;  %v587_v37 = vld [vmem:[%s2054_s2 + $0x40] sm:$0xff]  ;;  %v588_v38 = vld [vmem:[%s2054_s2 + $0x48] sm:$0xff] }
  0x18   :  { %1077 = vmatprep.subr.bf16.mxu0 %v1266_v27  ;;  %v1084_v36 = vpack.c.bf16 %v586_v35, %v585_v34  ;;  %v1087_v39 = vpack.c.bf16 %v588_v38, %v587_v37  ;;  %v589_v40 = vld [vmem:[%s2054_s2 + $0x50] sm:$0xff]  ;;  %v590_v41 = vld [vmem:[%s2054_s2 + $0x58] sm:$0xff]  ;;  %v591_v43 = vld [vmem:[%s2054_s2 + $0x60] sm:$0xff] }
  0x19   :  { %v1090_v42 = vpack.c.bf16 %v590_v41, %v589_v40  ;;  %v592_v44 = vld [vmem:[%s2054_s2 + $0x68] sm:$0xff]  ;;  %v593_v46 = vld [vmem:[%s2054_s2 + $0x70] sm:$0xff]  ;;  %v594_v47 = vld [vmem:[%s2054_s2 + $0x78] sm:$0xff] }
  0x1a   :  { %125 = vrot.lane.b32.xlu1 %v64_v12, %s1265_s28  ;;  %123 = vrot.lane.b32.xlu0 %v63_v13, %s1265_s28  ;;  %v1093_v45 = vpack.c.bf16 %v592_v44, %v591_v43  ;;  %v1096_v48 = vpack.c.bf16 %v594_v47, %v593_v46  ;;  %v29_v49 = vld [vmem:[%s2052_s0 + $0x10] sm:$0xff]  ;;  %v27_v50 = vld [vmem:[%s2052_s0] sm:$0xff] }
  0x1b   :  { %1079 = vmatpush1.bf16.msra.mxu0 %v1078_v30  ;;  %v595_v54 = vld [vmem:[%s2054_s2 + $0x80] sm:$0xff]  ;;  %v596_v55 = vld [vmem:[%s2054_s2 + $0x88] sm:$0xff]  ;;  %v30_v57 = vld [vmem:[%s2052_s0 + $0x18] sm:$0xff] }
  0x1c   :  { %1080 = vmatprep.subr.bf16.mxu0 %v1266_v27  ;;  %v28_v58 = vld [vmem:[%s2052_s0 + $0x8] sm:$0xff]  ;;  %v1099_v63 = vpack.c.bf16 %v596_v55, %v595_v54  ;;  %v597_v4 = vld [vmem:[%s2054_s2 + $0x90] sm:$0xff]  ;;  %v598_v5 = vld [vmem:[%s2054_s2 + $0x98] sm:$0xff]  ;;  %s996_s2 = sshll.u32 %s1272_s9, 4  ;;  %s997_s2 = int_to_ptr.vmem [resolvable:$true] %s996_s2 }
  0x1d   :  { %v32_v9 = vld [vmem:[%s2052_s0 + $0x28] sm:$0xff]  ;;  %v31_v10 = vld [vmem:[%s2052_s0 + $0x20] sm:$0xff]  ;;  %v34_v31 = vld [vmem:[%s2052_s0 + $0x38] sm:$0xff]  ;;  %s1241_s10 = scalar_lea.vmem %s997_s2, 128  ;;  %p1246_p1 = scmp.lt.s32.totalorder %s997_s2, %s997_s2 }
  0x1e   :  { %129 = vrot.lane.b32.xlu1 %v66_v14, %s1265_s28  ;;  %127 = vrot.lane.b32.xlu0 %v65_v15, %s1265_s28  ;;  %v1102_v15 = vpack.c.bf16 %v598_v5, %v597_v4  ;;  %v33_v32 = vld [vmem:[%s2052_s0 + $0x30] sm:$0xff]  ;;  %p1242_p0 = scmp.ne.s32.totalorder %s997_s2, %s1241_s10  ;;  %p1247_p2 = scmp.lt.s32.totalorder %s1241_s10, %s1241_s10 }
  0x1f   :  { %1082 = vmatpush1.bf16.msra.mxu0 %v1081_v33 }
  0x20   :  { %1083 = vmatprep.subr.bf16.mxu0 %v1266_v27  ;;  %p1248_p3 = por %p1247_p2, %p1246_p1 }
  0x22   :  { %133 = vrot.lane.b32.xlu1 %v68_v16, %s1265_s28  ;;  %131 = vrot.lane.b32.xlu0 %v67_v17, %s1265_s28  ;;  %p1249_p4 = pnand %p1248_p3, %p1242_p0 }
  0x23   :  { %1085 = vmatpush1.bf16.msra.mxu0 %v1084_v36 }
  0x24   :  { %1086 = vmatprep.subr.bf16.mxu0 %v1266_v27 }
  0x26   :  { %135 = vrot.lane.b32.xlu0 %v69_v18, %s1265_s28  ;;  %137 = vrot.lane.b32.xlu1 %v70_v19, %s1265_s28 }
  0x27   :  { %1088 = vmatpush1.bf16.msra.mxu0 %v1087_v39 }
  0x28   :  { %1089 = vmatprep.subr.bf16.mxu0 %v1266_v27 }
  0x2a   :  { %139 = vrot.lane.b32.xlu0 %v71_v20, %s1265_s28  ;;  %141 = vrot.lane.b32.xlu1 %v72_v21, %s1265_s28 }
  0x2b   :  { %1091 = vmatpush1.bf16.msra.mxu0 %v1090_v42 }
  0x2c   :  { %1092 = vmatprep.subr.bf16.mxu0 %v1266_v27 }
  0x2e   :  { %143 = vrot.lane.b32.xlu0 %v73_v22, %s1265_s28  ;;  %145 = vrot.lane.b32.xlu1 %v74_v23, %s1265_s28  ;;  %s1268_s28 = smov 32  }
  0x2f   :  { %1094 = vmatpush1.bf16.msra.mxu0 %v1093_v45 }
  0x30   :  { %1095 = vmatprep.subr.bf16.mxu0 %v1266_v27 }
  0x33   :  { %1097 = vmatpush1.bf16.msra.mxu0 %v1096_v48 }
  0x34   :  { %1098 = vmatprep.subr.bf16.mxu0 %v1266_v27 }
  0x37   :  { %1100 = vmatpush1.bf16.msra.mxu0 %v1099_v63 }
  0x38   :  { %1101 = vmatprep.subr.bf16.mxu0 %v1266_v27 }
  0x3b   :  { %1103 = vmatpush1.bf16.msra.mxu0 %v1102_v15 }
  0x74   :  { %v104_v51 = vpop.permute.xlu1 %103  ;;  %v100_v52 = vpop.permute.xlu0 %99 }
  0x75   :  { %v1474_v53 = vsel %vm171_vm0, %v29_v49, %v104_v51  ;;  %v1483_v56 = vsel %vm171_vm0, %v27_v50, %v100_v52  ;;  %v36_v49 = vld [vmem:[%s2052_s0 + $0x48] sm:$0xff]  ;;  %v35_v50 = vld [vmem:[%s2052_s0 + $0x40] sm:$0xff] }
  0x76   :  { %v224_v59 = vrot.slane %v1474_v53, 1  ;;  %v313_v60 = vrot.slane %v1474_v53, 2  ;;  %v402_v0 = vrot.slane %v1474_v53, 3  ;;  %v221_v1 = vrot.slane %v1483_v56, 1 }
  0x77   :  { %v310_v6 = vrot.slane %v1483_v56, 2  ;;  %v399_v7 = vrot.slane %v1483_v56, 3  ;;  %v488_v11 = vrot.slane %v1483_v56, 4 }
  0x78   :  { %v106_v61 = vpop.permute.xlu1 %105  ;;  %v102_v62 = vpop.permute.xlu0 %101 }
  0x79   :  { %v1496_v2 = vsel %vm171_vm0, %v30_v57, %v106_v61  ;;  %v1499_v3 = vsel %vm171_vm0, %v28_v58, %v102_v62 }
  0x7a   :  { %v222_v8 = vrot.slane %v1499_v3, 1  ;;  %v226_v12 = vrot.slane %v1496_v2, 1  ;;  %v311_v13 = vrot.slane %v1499_v3, 2  ;;  %v489_v14 = vrot.slane %v1499_v3, 4 }
  0x7b   :  { %v315_v16 = vrot.slane %v1496_v2, 2  ;;  %v400_v17 = vrot.slane %v1499_v3, 3  ;;  %v404_v26 = vrot.slane %v1496_v2, 3 }
  0x7c   :  { %v110_v18 = vpop.permute.xlu1 %109  ;;  %v108_v19 = vpop.permute.xlu0 %107  ;;  %v223_v20 = vsel %vm220_vm4, %v221_v1, %v222_v8  ;;  %v225_v21 = vsel %vm220_vm4, %v222_v8, %v224_v59  ;;  %v490_v24 = vsel %vm487_vm1, %v488_v11, %v489_v14  ;;  %v312_v25 = vsel %vm309_vm3, %v310_v6, %v311_v13  ;;  %v37_v8 = vld [vmem:[%s2052_s0 + $0x50] sm:$0xff] }
  0x7d   :  { %v1526_v22 = vsel %vm171_vm0, %v32_v9, %v110_v18  ;;  %v1529_v23 = vsel %vm171_vm0, %v31_v10, %v108_v19  ;;  %1005 = vmatprep.mubr.msk.f32.mxu0 %vm528_vm2, %v490_v24  ;;  %v314_v36 = vsel %vm309_vm3, %v311_v13, %v313_v60  ;;  %v1136_v38 = vpack.i.bf16 %v225_v21, %v223_v20 }
  0x7e   :  { %v229_v28 = vrot.slane %v1526_v22, 1  ;;  %v318_v29 = vrot.slane %v1526_v22, 2  ;;  %v407_v30 = vrot.slane %v1526_v22, 3  ;;  %v227_v33 = vrot.slane %v1529_v23, 1 }
  0x7f   :  { %v316_v34 = vrot.slane %v1529_v23, 2  ;;  %v405_v35 = vrot.slane %v1529_v23, 3  ;;  %v1141_v37 = vpack.i.bf16 %v314_v36, %v312_v25  ;;  %v401_v41 = vsel %vm398_vm5, %v399_v7, %v400_v17  ;;  %1137 = vrot.lane.b32.xlu0 %v1136_v38, %s1268_s28  ;;  %v38_v7 = vld [vmem:[%s2052_s0 + $0x58] sm:$0xff] }
  0x80   :  { %v114_v39 = vpop.permute.xlu1 %113  ;;  %v112_v40 = vpop.permute.xlu0 %111  ;;  %v403_v42 = vsel %vm398_vm5, %v400_v17, %v402_v0  ;;  %v228_v45 = vsel %vm220_vm4, %v226_v12, %v227_v33  ;;  %v230_v46 = vsel %vm220_vm4, %v227_v33, %v229_v28  ;;  %v491_v1 = vrot.slane %v1474_v53, 4 }
  0x81   :  { %v1553_v43 = vsel %vm171_vm0, %v34_v31, %v114_v39  ;;  %v1556_v44 = vsel %vm171_vm0, %v33_v32, %v112_v40  ;;  %1142 = vrot.lane.b32.xlu1 %v1141_v37, %s1267_s12  ;;  %v1151_v54 = vpack.i.bf16 %v230_v46, %v228_v45  ;;  %v1146_v55 = vpack.i.bf16 %v403_v42, %v401_v41 }
  0x82   :  { %v232_v47 = vrot.slane %v1553_v43, 1  ;;  %v321_v48 = vrot.slane %v1553_v43, 2  ;;  %v231_v51 = vrot.slane %v1556_v44, 1  ;;  %v320_v52 = vrot.slane %v1556_v44, 2 }
  0x83   :  { %v406_v59 = vsel %vm398_vm5, %v404_v26, %v405_v35  ;;  %v408_v60 = vsel %vm398_vm5, %v405_v35, %v407_v30  ;;  %v317_v61 = vsel %vm309_vm3, %v315_v16, %v316_v34  ;;  %v319_v62 = vsel %vm309_vm3, %v316_v34, %v318_v29  ;;  %1147 = vrot.lane.b32.xlu0 %v1146_v55, %s1269_s17  ;;  %v40_v29 = vld [vmem:[%s2052_s0 + $0x68] sm:$0xff]  ;;  %v39_v30 = vld [vmem:[%s2052_s0 + $0x60] sm:$0xff]  ;;  %v42_v55 = vld [vmem:[%s2052_s0 + $0x78] sm:$0xff] }
  0x84   :  { %v118_v57 = vpop.permute.xlu1 %117  ;;  %v116_v58 = vpop.permute.xlu0 %115  ;;  %v410_v4 = vrot.slane %v1553_v43, 3  ;;  %v409_v5 = vrot.slane %v1556_v44, 3  ;;  %v1161_v10 = vpack.i.bf16 %v408_v60, %v406_v59  ;;  %v1156_v11 = vpack.i.bf16 %v319_v62, %v317_v61 }
  0x85   :  { %v1577_v63 = vsel %vm171_vm0, %v36_v49, %v118_v57  ;;  %v1580_v0 = vsel %vm171_vm0, %v35_v50, %v116_v58  ;;  %1152 = vrot.lane.b32.xlu1 %v1151_v54, %s1268_s28  ;;  %v322_v16 = vsel %vm309_vm3, %v320_v52, %v321_v48  ;;  %v233_v17 = vsel %vm220_vm4, %v231_v51, %v232_v47 }
  0x86   :  { %v234_v6 = vrot.slane %v1580_v0, 1  ;;  %v236_v53 = vrot.slane %v1577_v63, 1  ;;  %v323_v9 = vrot.slane %v1580_v0, 2  ;;  %v412_v12 = vrot.slane %v1580_v0, 3 }
  0x87   :  { %v325_v19 = vrot.slane %v1577_v63, 2  ;;  %v414_v25 = vrot.slane %v1577_v63, 3  ;;  %1157 = vrot.lane.b32.xlu0 %v1156_v11, %s1267_s12  ;;  %v411_v31 = vsel %vm398_vm5, %v409_v5, %v410_v4  ;;  %v1628_v41 = vsel %vm487_vm1, %v489_v14, %v491_v1  ;;  %v41_v14 = vld [vmem:[%s2052_s0 + $0x70] sm:$0xff] }
  0x88   :  { %v122_v13 = vpop.permute.xlu1 %121  ;;  %v120_v15 = vpop.permute.xlu0 %119  ;;  %v235_v18 = vsel %vm220_vm4, %v232_v47, %v234_v6  ;;  %v324_v24 = vsel %vm309_vm3, %v321_v48, %v323_v9  ;;  %v413_v40 = vsel %vm398_vm5, %v410_v4, %v412_v12  ;;  %v44_v9 = vld [vmem:[%s2052_s0 + $0x88] sm:$0xff]  ;;  %v496_v11 = vrot.slane %v1526_v22, 4 }
  0x89   :  { %v1602_v20 = vsel %vm171_vm0, %v38_v7, %v122_v13  ;;  %v1605_v21 = vsel %vm171_vm0, %v37_v8, %v120_v15  ;;  %1162 = vrot.lane.b32.xlu1 %v1161_v10, %s1269_s17  ;;  %v1166_v28 = vpack.i.bf16 %v235_v18, %v233_v17  ;;  %v1171_v35 = vpack.i.bf16 %v324_v24, %v322_v16  ;;  %v43_v10 = vld [vmem:[%s2052_s0 + $0x80] sm:$0xff] }
  0x8a   :  { %v239_v26 = vrot.slane %v1602_v20, 1  ;;  %v328_v32 = vrot.slane %v1602_v20, 2  ;;  %v417_v33 = vrot.slane %v1602_v20, 3  ;;  %v237_v34 = vrot.slane %v1605_v21, 1 }
  0x8b   :  { %v326_v36 = vrot.slane %v1605_v21, 2  ;;  %v415_v37 = vrot.slane %v1605_v21, 3  ;;  %1167 = vrot.lane.b32.xlu0 %v1166_v28, %s1268_s28  ;;  %v1176_v54 = vpack.i.bf16 %v413_v40, %v411_v31  ;;  %v494_v13 = vrot.slane %v1529_v23, 4 }
  0x8c   :  { %v126_v38 = vpop.permute.xlu1 %125  ;;  %v124_v39 = vpop.permute.xlu0 %123  ;;  %v238_v46 = vsel %vm220_vm4, %v236_v53, %v237_v34  ;;  %v240_v47 = vsel %vm220_vm4, %v237_v34, %v239_v26 }
  0x8d   :  { %v1631_v42 = vsel %vm171_vm0, %v40_v29, %v126_v38  ;;  %v1634_v45 = vsel %vm171_vm0, %v39_v30, %v124_v39  ;;  %1172 = vrot.lane.b32.xlu1 %v1171_v35, %s1267_s12  ;;  %v1181_v52 = vpack.i.bf16 %v240_v47, %v238_v46  ;;  %v416_v59 = vsel %vm398_vm5, %v414_v25, %v415_v37 }
  0x8e   :  { %v242_v48 = vrot.slane %v1631_v42, 1  ;;  %v331_v49 = vrot.slane %v1631_v42, 2  ;;  %v241_v50 = vrot.slane %v1634_v45, 1  ;;  %v330_v51 = vrot.slane %v1634_v45, 2 }
  0x8f   :  { %v418_v60 = vsel %vm398_vm5, %v415_v37, %v417_v33  ;;  %v327_v61 = vsel %vm309_vm3, %v325_v19, %v326_v36  ;;  %v329_v62 = vsel %vm309_vm3, %v326_v36, %v328_v32  ;;  %v420_v1 = vrot.slane %v1631_v42, 3  ;;  %1177 = vrot.lane.b32.xlu0 %v1176_v54, %s1269_s17  ;;  %v45_v32 = vld [vmem:[%s2052_s0 + $0x90] sm:$0xff] }
  0x90   :  { %v130_v57 = vpop.permute.xlu1 %129  ;;  %v128_v58 = vpop.permute.xlu0 %127  ;;  %v419_v4 = vrot.slane %v1634_v45, 3  ;;  %v1191_v8 = vpack.i.bf16 %v418_v60, %v416_v59  ;;  %v1186_v53 = vpack.i.bf16 %v329_v62, %v327_v61  ;;  %v332_v18 = vsel %vm309_vm3, %v330_v51, %v331_v49 }
  0x91   :  { %v1657_v5 = vsel %vm171_vm0, %v41_v14, %v128_v58  ;;  %1182 = vrot.lane.b32.xlu1 %v1181_v52, %s1268_s28  ;;  %v1662_v6 = vsel %vm171_vm0, %v42_v55, %v130_v57  ;;  %v243_v19 = vsel %vm220_vm4, %v241_v50, %v242_v48  ;;  %v47_v58 = vld [vmem:[%s2052_s0 + $0xa0] sm:$0xff] }
  0x92   :  { %v244_v7 = vrot.slane %v1657_v5, 1  ;;  %v333_v12 = vrot.slane %v1657_v5, 2  ;;  %v422_v15 = vrot.slane %v1657_v5, 3  ;;  %v246_v25 = vrot.slane %v1662_v6, 1 }
  0x93   :  { %v424_v29 = vrot.slane %v1662_v6, 3  ;;  %1187 = vrot.lane.b32.xlu0 %v1186_v53, %s1267_s12  ;;  %v421_v33 = vsel %vm398_vm5, %v419_v4, %v420_v1  ;;  %v335_v38 = vrot.slane %v1662_v6, 2 }
  0x94   :  { %v134_v16 = vpop.permute.xlu1 %133  ;;  %v132_v17 = vpop.permute.xlu0 %131  ;;  %v245_v24 = vsel %vm220_vm4, %v242_v48, %v244_v7  ;;  %v334_v28 = vsel %vm309_vm3, %v331_v49, %v333_v12  ;;  %v423_v46 = vsel %vm398_vm5, %v420_v1, %v422_v15  ;;  %v46_v48 = vld [vmem:[%s2052_s0 + $0x98] sm:$0xff]  ;;  %v1706_v49 = vsel %vm487_vm1, %v494_v13, %v496_v11 }
  0x95   :  { %v1680_v26 = vsel %vm171_vm0, %v44_v9, %v134_v16  ;;  %v1683_v22 = vsel %vm171_vm0, %v43_v10, %v132_v17  ;;  %1192 = vrot.lane.b32.xlu1 %v1191_v8, %s1269_s17  ;;  %v1196_v31 = vpack.i.bf16 %v245_v24, %v243_v19  ;;  %v1201_v37 = vpack.i.bf16 %v334_v28, %v332_v18  ;;  %v48_v9 = vld [vmem:[%s2052_s0 + $0xa8] sm:$0xff]  ;;  %v49_v24 = vld [vmem:[%s2052_s0 + $0xb0] sm:$0xff] }
  0x96   :  { %v249_v30 = vrot.slane %v1680_v26, 1  ;;  %v427_v34 = vrot.slane %v1680_v26, 3  ;;  %v247_v35 = vrot.slane %v1683_v22, 1  ;;  %v425_v36 = vrot.slane %v1683_v22, 3 }
  0x97   :  { %v336_v39 = vrot.slane %v1683_v22, 2  ;;  %v338_v14 = vrot.slane %v1680_v26, 2  ;;  %1197 = vrot.lane.b32.xlu0 %v1196_v31, %s1268_s28  ;;  %v1206_v57 = vpack.i.bf16 %v423_v46, %v421_v33 }
  0x98   :  { %v136_v40 = vpop.permute.xlu0 %135  ;;  %v138_v47 = vpop.permute.xlu1 %137  ;;  %v248_v51 = vsel %vm220_vm4, %v246_v25, %v247_v35  ;;  %v250_v52 = vsel %vm220_vm4, %v247_v35, %v249_v30  ;;  %v426_v61 = vsel %vm398_vm5, %v424_v29, %v425_v36  ;;  %v428_v62 = vsel %vm398_vm5, %v425_v36, %v427_v34 }
  0x99   :  { %v1710_v50 = vsel %vm171_vm0, %v45_v32, %v136_v40  ;;  %1202 = vrot.lane.b32.xlu1 %v1201_v37, %s1267_s12  ;;  %v1211_v55 = vpack.i.bf16 %v250_v52, %v248_v51  ;;  %v1722_v60 = vsel %vm171_vm0, %v46_v48, %v138_v47  ;;  %v337_v8 = vsel %vm309_vm3, %v335_v38, %v336_v39 }
  0x9a   :  { %v251_v54 = vrot.slane %v1710_v50, 1  ;;  %v340_v59 = vrot.slane %v1710_v50, 2  ;;  %v252_v1 = vrot.slane %v1722_v60, 1  ;;  %v341_v4 = vrot.slane %v1722_v60, 2 }
  0x9b   :  { %v429_v10 = vrot.slane %v1710_v50, 3  ;;  %v430_v11 = vrot.slane %v1722_v60, 3  ;;  %v339_v15 = vsel %vm309_vm3, %v336_v39, %v338_v14  ;;  %1207 = vrot.lane.b32.xlu0 %v1206_v57, %s1269_s17  ;;  %v1221_v19 = vpack.i.bf16 %v428_v62, %v426_v61 }
  0x9c   :  { %v140_v7 = vpop.permute.xlu0 %139  ;;  %v142_v53 = vpop.permute.xlu1 %141  ;;  %v1216_v25 = vpack.i.bf16 %v339_v15, %v337_v8  ;;  %v342_v29 = vsel %vm309_vm3, %v340_v59, %v341_v4  ;;  %v253_v30 = vsel %vm220_vm4, %v251_v54, %v252_v1  ;;  %v501_v34 = vrot.slane %v1580_v0, 4  ;;  %v50_v0 = vld [vmem:[%s2052_s0 + $0xb8] sm:$0xff] }
  0x9d   :  { %v192_v12 = vsel %vm171_vm0, %v47_v58, %v140_v7  ;;  %1212 = vrot.lane.b32.xlu1 %v1211_v55, %s1268_s28  ;;  %v1742_v28 = vsel %vm171_vm0, %v48_v9, %v142_v53  ;;  %v431_v36 = vsel %vm398_vm5, %v429_v10, %v430_v11  ;;  %v506_v48 = vrot.slane %v1602_v20, 4 }
  0x9e   :  { %v254_v16 = vrot.slane %v192_v12, 1  ;;  %v343_v17 = vrot.slane %v192_v12, 2  ;;  %v432_v18 = vrot.slane %v192_v12, 3  ;;  %v256_v40 = vrot.slane %v1742_v28, 1 }
  0x9f   :  { %1217 = vrot.lane.b32.xlu0 %v1216_v25, %s1267_s12  ;;  %v499_v14 = vrot.slane %v1553_v43, 4  ;;  %v511_v51 = vrot.slane %v1657_v5, 4  ;;  %v516_v52 = vrot.slane %v1680_v26, 4  ;;  %v521_v54 = vrot.slane %v192_v12, 4 }
  0xa0   :  { %v144_v31 = vpop.permute.xlu0 %143  ;;  %v344_v32 = vsel %vm309_vm3, %v341_v4, %v343_v17  ;;  %v255_v33 = vsel %vm220_vm4, %v252_v1, %v254_v16  ;;  %v433_v37 = vsel %vm398_vm5, %v430_v11, %v432_v18  ;;  %v146_v47 = vpop.permute.xlu1 %145  ;;  %v345_v58 = vrot.slane %v1742_v28, 2 }
  0xa1   :  { %v1750_v35 = vsel %vm171_vm0, %v49_v24, %v144_v31  ;;  %1222 = vrot.lane.b32.xlu1 %v1221_v19, %s1269_s17  ;;  %v1231_v38 = vpack.i.bf16 %v344_v32, %v342_v29  ;;  %v1226_v39 = vpack.i.bf16 %v255_v33, %v253_v30  ;;  %v1236_v55 = vpack.i.bf16 %v433_v37, %v431_v36 }
  0xa2   :  { %v257_v46 = vrot.slane %v1750_v35, 1  ;;  %v195_v57 = vsel %vm171_vm0, %v50_v0, %v146_v47  ;;  %v1770_v59 = vsel %vm487_vm1, %v499_v14, %v501_v34  ;;  %v504_v61 = vrot.slane %v1605_v21, 4 }
  0xa3   :  { %1227 = vrot.lane.b32.xlu0 %v1226_v39, %s1268_s28  ;;  %v526_v5 = vrot.slane %v195_v57, 4  ;;  %v346_v26 = vrot.slane %v1750_v35, 2  ;;  %v509_v62 = vrot.slane %v1631_v42, 4  ;;  %v434_v1 = vrot.slane %v1742_v28, 3 }
  0xa4   :  { %v258_v20 = vsel %vm220_vm4, %v256_v40, %v257_v46  ;;  %v435_v4 = vrot.slane %v1750_v35, 3  ;;  %v1783_v7 = vsel %vm487_vm1, %v504_v61, %v506_v48  ;;  %v514_v8 = vrot.slane %v1683_v22, 4 }
  0xa5   :  { %1232 = vrot.lane.b32.xlu1 %v1231_v38, %s1267_s12  ;;  %v1789_v53 = vsel %vm487_vm1, %v509_v62, %v511_v51  ;;  %v519_v9 = vrot.slane %v1722_v60, 4  ;;  %v524_v11 = vrot.slane %v1750_v35, 4  ;;  %v259_v12 = vrot.slane %v195_v57, 1 }
  0xa6   :  { %v1795_v10 = vsel %vm487_vm1, %v514_v8, %v516_v52  ;;  %v348_v16 = vrot.slane %v195_v57, 2  ;;  %v347_v17 = vsel %vm309_vm3, %v345_v58, %v346_v26  ;;  %v436_v18 = vsel %vm398_vm5, %v434_v1, %v435_v4 }
  0xa7   :  { %1237 = vrot.lane.b32.xlu0 %v1236_v55, %s1269_s17  ;;  %v1803_v15 = vsel %vm487_vm1, %v519_v9, %v521_v54  ;;  %v1810_v19 = vsel %vm487_vm1, %v524_v11, %v526_v5  ;;  %v437_v24 = vrot.slane %v195_v57, 3  ;;  %v260_v25 = vsel %vm220_vm4, %v257_v46, %v259_v12 }
  0xa8   :  { %v349_v29 = vsel %vm309_vm3, %v346_v26, %v348_v16 }
  0xa9   :  { %289 = vrot.lane.b32.xlu1 %v258_v20, %s1268_s28  ;;  %v438_v30 = vsel %vm398_vm5, %v435_v4, %v437_v24 }
  0xab   :  { %378 = vrot.lane.b32.xlu0 %v347_v17, %s1267_s12 }
  0xad   :  { %467 = vrot.lane.b32.xlu1 %v436_v18, %s1269_s17 }
  0xaf   :  { %291 = vrot.lane.b32.xlu0 %v260_v25, %s1268_s28 }
  0xb1   :  { %380 = vrot.lane.b32.xlu1 %v349_v29, %s1267_s12 }
  0xb3   :  { %469 = vrot.lane.b32.xlu0 %v438_v30, %s1269_s17 }
  0xf1   :  { %v1138_v32 = vpop.permute.xlu0 %1137 }
  0xf2   :  { %v1139_v33 = vunpack.i.l.bf16 %v1138_v32  ;;  %v1140_v36 = vunpack.i.h.bf16 %v1138_v32 }
  0xf3   :  { %v1143_v31 = vpop.permute.xlu1 %1142 }
  0xf4   :  { %v1144_v34 = vunpack.i.l.bf16 %v1143_v31  ;;  %v529_v37 = vsel %vm528_vm2, %v1483_v56, %v1139_v33  ;;  %v1145_v46 = vunpack.i.h.bf16 %v1143_v31  ;;  %v530_v52 = vsel %vm528_vm2, %v1499_v3, %v1140_v36 }
  0xf5   :  { %v1148_v39 = vpop.permute.xlu0 %1147  ;;  %v493_v56 = vrot.slane %v1496_v2, 4  ;;  %v498_v31 = vrot.slane %v1556_v44, 4 }
  0xf6   :  { %v1149_v40 = vunpack.i.l.bf16 %v1148_v39  ;;  %v546_v47 = vsel %vm545_vm6, %v529_v37, %v1144_v34  ;;  %v1150_v48 = vunpack.i.h.bf16 %v1148_v39  ;;  %v547_v58 = vsel %vm545_vm6, %v530_v52, %v1145_v46 }
  0xf7   :  { %v1153_v38 = vpop.permute.xlu1 %1152  ;;  %v495_v16 = vsel %vm487_vm1, %v493_v56, %v494_v13 }
  0xf8   :  { %v1154_v0 = vunpack.i.l.bf16 %v1153_v38  ;;  %v563_v51 = vsel %vm562_vm7, %v546_v47, %v1149_v40  ;;  %v1155_v20 = vunpack.i.h.bf16 %v1153_v38  ;;  %v564_v26 = vsel %vm562_vm7, %v547_v58, %v1150_v48 }
  0xf9   :  { %v1158_v55 = vpop.permute.xlu0 %1157  ;;  %703 = vmatmul.mubr.f32.vlgmr.msra.gmra.mrb[0].mxu0 %v563_v51  ;;  %v503_v51 = vrot.slane %v1577_v63, 4 }
  0xfa   :  { %v1159_v57 = vunpack.i.l.bf16 %v1158_v55  ;;  %1006 = vmatprep.mubr.msk.f32.mxu0 %vm528_vm2, %v1628_v41  ;;  %v531_v1 = vsel %vm528_vm2, %v1496_v2, %v1154_v0  ;;  %v1160_v4 = vunpack.i.h.bf16 %v1158_v55  ;;  %v532_v25 = vsel %vm528_vm2, %v1529_v23, %v1155_v20 }
  0xfb   :  { %v1163_v54 = vpop.permute.xlu1 %1162  ;;  %v500_v23 = vsel %vm487_vm1, %v498_v31, %v499_v14  ;;  %v505_v20 = vsel %vm487_vm1, %v503_v51, %v504_v61 }
  0xfc   :  { %v1164_v5 = vunpack.i.l.bf16 %v1163_v54  ;;  %v548_v17 = vsel %vm545_vm6, %v531_v1, %v1159_v57  ;;  %v1165_v41 = vunpack.i.h.bf16 %v1163_v54  ;;  %v549_v30 = vsel %vm545_vm6, %v532_v25, %v1160_v4 }
  0xfd   :  { %v1168_v12 = vpop.permute.xlu0 %1167  ;;  %708 = vmatmul.mubr.f32.gmra.mrb[2].mxu0 %v564_v26 }
  0xfe   :  { %1007 = vmatprep.mubr.msk.f32.mxu0 %vm528_vm2, %v495_v16  ;;  %v1169_v18 = vunpack.i.l.bf16 %v1168_v12  ;;  %v565_v24 = vsel %vm562_vm7, %v548_v17, %v1164_v5  ;;  %v1170_v32 = vunpack.i.h.bf16 %v1168_v12  ;;  %v566_v34 = vsel %vm562_vm7, %v549_v30, %v1165_v41 }
  0xff   :  { %v1173_v3 = vpop.permute.xlu1 %1172 }
 0x100   :  { %v1174_v13 = vunpack.i.l.bf16 %v1173_v3  ;;  %v533_v36 = vsel %vm528_vm2, %v1556_v44, %v1169_v18  ;;  %v1175_v39 = vunpack.i.h.bf16 %v1173_v3  ;;  %v534_v0 = vsel %vm528_vm2, %v1553_v43, %v1170_v32 }
 0x101   :  { %v1178_v29 = vpop.permute.xlu0 %1177  ;;  %713 = vmatmul.mubr.f32.gmra.mrb[4].mxu0 %v565_v24  ;;  %v508_v3 = vrot.slane %v1634_v45, 4 }
 0x102   :  { %1008 = vmatprep.mubr.msk.f32.mxu0 %vm528_vm2, %v1706_v49  ;;  %v1179_v33 = vunpack.i.l.bf16 %v1178_v29  ;;  %v550_v49 = vsel %vm545_vm6, %v533_v36, %v1174_v13  ;;  %v1180_v46 = vunpack.i.h.bf16 %v1178_v29  ;;  %v551_v14 = vsel %vm545_vm6, %v534_v0, %v1175_v39 }
 0x103   :  { %v1183_v2 = vpop.permute.xlu1 %1182 }
 0x104   :  { %v1184_v40 = vunpack.i.l.bf16 %v1183_v2  ;;  %v567_v47 = vsel %vm562_vm7, %v550_v49, %v1179_v33  ;;  %v1185_v52 = vunpack.i.h.bf16 %v1183_v2  ;;  %v568_v56 = vsel %vm562_vm7, %v551_v14, %v1180_v46 }
 0x105   :  { %v1188_v37 = vpop.permute.xlu0 %1187  ;;  %718 = vmatmul.mubr.f32.gmra.mrb[6].mxu0 %v566_v34  ;;  %v513_v33 = vrot.slane %v1662_v6, 4 }
 0x106   :  { %1009 = vmatprep.mubr.msk.f32.mxu0 %vm528_vm2, %v500_v23  ;;  %v1189_v44 = vunpack.i.l.bf16 %v1188_v37  ;;  %v535_v57 = vsel %vm528_vm2, %v1577_v63, %v1184_v40  ;;  %v1190_v58 = vunpack.i.h.bf16 %v1188_v37  ;;  %v536_v4 = vsel %vm528_vm2, %v1605_v21, %v1185_v52 }
 0x107   :  { %v1193_v38 = vpop.permute.xlu1 %1192  ;;  %v510_v21 = vsel %vm487_vm1, %v508_v3, %v509_v62 }
 0x108   :  { %v1194_v54 = vunpack.i.l.bf16 %v1193_v38  ;;  %v552_v5 = vsel %vm545_vm6, %v535_v57, %v1189_v44  ;;  %v553_v63 = vsel %vm545_vm6, %v536_v4, %v1190_v58  ;;  %v518_v44 = vrot.slane %v1710_v50, 4 }
 0x109   :  { %v1198_v48 = vpop.permute.xlu0 %1197  ;;  %723 = vmatmul.mubr.f32.gmra.mrb[8].mxu0 %v567_v47 }
 0x10a   :  { %1010 = vmatprep.mubr.msk.f32.mxu0 %vm528_vm2, %v1770_v59  ;;  %v1195_v59 = vunpack.i.h.bf16 %v1193_v38  ;;  %v1199_v26 = vunpack.i.l.bf16 %v1198_v48  ;;  %v569_v1 = vsel %vm562_vm7, %v552_v5, %v1194_v54  ;;  %v1200_v17 = vunpack.i.h.bf16 %v1198_v48 }
 0x10b   :  { %v1203_v55 = vpop.permute.xlu1 %1202 }
 0x10c   :  { %v1204_v61 = vunpack.i.l.bf16 %v1203_v55  ;;  %v570_v18 = vsel %vm562_vm7, %v553_v63, %v1195_v59  ;;  %v537_v24 = vsel %vm528_vm2, %v1634_v45, %v1199_v26  ;;  %v1205_v25 = vunpack.i.h.bf16 %v1203_v55 }
 0x10d   :  { %v1208_v43 = vpop.permute.xlu0 %1207  ;;  %728 = vmatmul.mubr.f32.gmra.mrb[10].mxu0 %v568_v56  ;;  %v538_v13 = vsel %vm528_vm2, %v1631_v42, %v1200_v17  ;;  %v515_v42 = vsel %vm487_vm1, %v513_v33, %v514_v8  ;;  %v877_v17 = vld [vmem:[%s2057_s5 + $0x20] sm:$0xff] }
 0x10e   :  { %1011 = vmatprep.mubr.msk.f32.mxu0 %vm528_vm2, %v505_v20  ;;  %v1209_v41 = vunpack.i.l.bf16 %v1208_v43  ;;  %v554_v2 = vsel %vm545_vm6, %v537_v24, %v1204_v61  ;;  %v1210_v29 = vunpack.i.h.bf16 %v1208_v43  ;;  %v555_v62 = vsel %vm545_vm6, %v538_v13, %v1205_v25  ;;  %v880_v25 = vld [vmem:[%s2057_s5 + $0x38] sm:$0xff]  ;;  %v883_v13 = vld [vmem:[%s2057_s5 + $0x50] sm:$0xff]  ;;  %v885_v33 = vld [vmem:[%s2057_s5 + $0x60] sm:$0xff] }
 0x10f   :  { %v1213_v12 = vpop.permute.xlu1 %1212 }
 0x110   :  { %v571_v31 = vsel %vm562_vm7, %v554_v2, %v1209_v41  ;;  %v1215_v34 = vunpack.i.h.bf16 %v1213_v12  ;;  %v572_v37 = vsel %vm562_vm7, %v555_v62, %v1210_v29  ;;  %v881_v29 = vld [vmem:[%s2057_s5 + $0x40] sm:$0xff]  ;;  %v886_v62 = vld [vmem:[%s2057_s5 + $0x68] sm:$0xff] }
 0x111   :  { %733 = vmatmul.mubr.f32.gmra.mrb[12].mxu0 %v569_v1  ;;  %v1218_v16 = vpop.permute.xlu0 %1217 }
 0x112   :  { %1012 = vmatprep.mubr.msk.f32.mxu0 %vm528_vm2, %v1783_v7  ;;  %v1214_v7 = vunpack.i.l.bf16 %v1213_v12  ;;  %v1219_v32 = vunpack.i.l.bf16 %v1218_v16  ;;  %v1220_v38 = vunpack.i.h.bf16 %v1218_v16  ;;  %v540_v0 = vsel %vm528_vm2, %v1683_v22, %v1215_v34  ;;  %v876_v16 = vld [vmem:[%s2057_s5 + $0x18] sm:$0xff] }
 0x113   :  { %v1223_v30 = vpop.permute.xlu1 %1222  ;;  %v520_v22 = vsel %vm487_vm1, %v518_v44, %v519_v9  ;;  %v1123_v34 = vpack.c.bf16 %v886_v62, %v885_v33 }
 0x114   :  { %v1224_v36 = vunpack.i.l.bf16 %v1223_v30  ;;  %v539_v23 = vsel %vm528_vm2, %v1662_v6, %v1214_v7  ;;  %v1225_v40 = vunpack.i.h.bf16 %v1223_v30  ;;  %v557_v6 = vsel %vm545_vm6, %v540_v0, %v1220_v38  ;;  %v882_v30 = vld [vmem:[%s2057_s5 + $0x48] sm:$0xff]  ;;  %v1993_v38 = vld [vmem:[%s2055_s3] ss:$0 sm:$0xff] }
 0x115   :  { %738 = vmatmul.mubr.f32.gmra.mrb[14].mxu0 %v570_v18  ;;  %v1228_v45 = vpop.permute.xlu0 %1227  ;;  %v556_v39 = vsel %vm545_vm6, %v539_v23, %v1219_v32  ;;  %v878_v18 = vld [vmem:[%s2057_s5 + $0x28] sm:$0xff]  ;;  %v1271_v7 = vmov 0.0   ;;  %v884_v32 = vld [vmem:[%s2057_s5 + $0x58] sm:$0xff]  ;;  %v2000_v0 = vld [vmem:[%s2056_s4] sm:$0xff] }
 0x116   :  { %1013 = vmatprep.mubr.msk.f32.mxu0 %vm528_vm2, %v510_v21  ;;  %v1229_v46 = vunpack.i.l.bf16 %v1228_v45  ;;  %v573_v47 = vsel %vm562_vm7, %v556_v39, %v1224_v36  ;;  %v1230_v48 = vunpack.i.h.bf16 %v1228_v45  ;;  %v574_v52 = vsel %vm562_vm7, %v557_v6, %v1225_v40  ;;  %v879_v21 = vld [vmem:[%s2057_s5 + $0x30] sm:$0xff]  ;;  %1071 = vmatprep.mubr.msk.f32.mxu1 %vm1270_vm8, %v1271_v7 }
 0x117   :  { %v1233_v49 = vpop.permute.xlu1 %1232  ;;  %v1111_v24 = vpack.c.bf16 %v878_v18, %v877_v17  ;;  %v1114_v2 = vpack.c.bf16 %v880_v25, %v879_v21  ;;  %v1120_v45 = vpack.c.bf16 %v884_v32, %v883_v13  ;;  %v887_v36 = vld [vmem:[%s2057_s5 + $0x70] sm:$0xff] }
 0x118   :  { %v1234_v8 = vunpack.i.l.bf16 %v1233_v49  ;;  %v541_v54 = vsel %vm528_vm2, %v1710_v50, %v1229_v46  ;;  %v1235_v56 = vunpack.i.h.bf16 %v1233_v49  ;;  %v542_v43 = vsel %vm528_vm2, %v1722_v60, %v1230_v48 }
 0x119   :  { %743 = vmatmul.mubr.f32.gmra.mrb[16].mxu0 %v571_v31  ;;  %v523_v50 = vrot.slane %v1742_v28, 4  ;;  %v1117_v31 = vpack.c.bf16 %v882_v30, %v881_v29 }
 0x11a   :  { %1014 = vmatprep.mubr.msk.f32.mxu0 %vm528_vm2, %v1789_v53  ;;  %v1238_v53 = vpop.permute.xlu0 %1237  ;;  %v559_v9 = vsel %vm545_vm6, %v542_v43, %v1235_v56 }
 0x11b   :  { %v290_v51 = vpop.permute.xlu1 %289  ;;  %v1239_v14 = vunpack.i.l.bf16 %v1238_v53  ;;  %v1240_v57 = vunpack.i.h.bf16 %v1238_v53  ;;  %v525_v60 = vsel %vm487_vm1, %v523_v50, %v524_v11  ;;  %v873_v11 = vld [vmem:[%s2057_s5] sm:$0xff] }
 0x11c   :  { %v543_v59 = vsel %vm528_vm2, %v1742_v28, %v290_v51 }
 0x11d   :  { %748 = vmatmul.mubr.f32.gmra.mrb[18].mxu0 %v572_v37  ;;  %v576_v26 = vsel %vm562_vm7, %v559_v9, %v1240_v57  ;;  %v888_v37 = vld [vmem:[%s2057_s5 + $0x78] sm:$0xff] }
 0x11e   :  { %1015 = vmatprep.mubr.msk.f32.mxu0 %vm528_vm2, %v515_v42  ;;  %v379_v55 = vpop.permute.xlu0 %378  ;;  %v1126_v23 = vpack.c.bf16 %v888_v37, %v887_v36 }
 0x11f   :  { %v468_v20 = vpop.permute.xlu1 %467  ;;  %v560_v1 = vsel %vm545_vm6, %v543_v59, %v379_v55 }
 0x120   :  { %v577_v63 = vsel %vm562_vm7, %v560_v1, %v468_v20 }
 0x121   :  { %753 = vmatmul.mubr.f32.gmra.mrb[20].mxu0 %v573_v47 }
 0x122   :  { %1016 = vmatprep.mubr.msk.f32.mxu0 %vm528_vm2, %v1795_v10  ;;  %v558_v10 = vsel %vm545_vm6, %v541_v54, %v1234_v8  ;;  %v292_v5 = vpop.permute.xlu0 %291 }
 0x123   :  { %v575_v58 = vsel %vm562_vm7, %v558_v10, %v1239_v14  ;;  %v381_v4 = vpop.permute.xlu1 %380 }
 0x125   :  { %758 = vmatmul.mubr.f32.gmra.mrb[22].mxu0 %v574_v52 }
 0x126   :  { %1017 = vmatprep.mubr.msk.f32.mxu0 %vm528_vm2, %v520_v22  ;;  %v470_v3 = vpop.permute.xlu0 %469 }
 0x129   :  { %763 = vmatmul.mubr.f32.gmra.mrb[24].mxu0 %v575_v58 }
 0x12a   :  { %1018 = vmatprep.mubr.msk.f32.mxu0 %vm528_vm2, %v1803_v15  ;;  %v544_v15 = vsel %vm528_vm2, %v1750_v35, %v292_v5  ;;  %v874_v35 = vld [vmem:[%s2057_s5 + $0x8] sm:$0xff] }
 0x12b   :  { %v561_v28 = vsel %vm545_vm6, %v544_v15, %v381_v4  ;;  %v1105_v61 = vpack.c.bf16 %v874_v35, %v873_v11 }
 0x12c   :  { %v578_v12 = vsel %vm562_vm7, %v561_v28, %v470_v3 }
 0x12d   :  { %768 = vmatmul.mubr.f32.gmra.mrb[26].mxu0 %v576_v26  ;;  %1106 = vmatpush3.bf16.msra.mxu1 %v1105_v61 }
 0x12e   :  { %1019 = vmatprep.mubr.msk.f32.mxu0 %vm528_vm2, %v525_v60  ;;  %1107 = vmatprep.subr.bf16.mxu1 %v1266_v27 }
 0x131   :  { %773 = vmatmul.mubr.f32.gmra.mrb[28].mxu0 %v577_v63 }
 0x132   :  { %1020 = vmatprep.mubr.msk.f32.mxu0 %vm528_vm2, %v1810_v19  ;;  %v875_v19 = vld [vmem:[%s2057_s5 + $0x10] sm:$0xff] }
 0x133   :  { %v1108_v41 = vpack.c.bf16 %v876_v16, %v875_v19 }
 0x135   :  { %778 = vmatmul.mubr.f32.gmra.mrb[30].mxu0 %v578_v12  ;;  %1109 = vmatpush3.bf16.msra.mxu1 %v1108_v41 }
 0x136   :  { %1110 = vmatprep.subr.bf16.mxu1 %v1266_v27 }
 0x139   :  { %1112 = vmatpush3.bf16.msra.mxu1 %v1111_v24 }
 0x13a   :  { %1113 = vmatprep.subr.bf16.mxu1 %v1266_v27 }
 0x13d   :  { %1115 = vmatpush3.bf16.msra.mxu1 %v1114_v2 }
 0x13e   :  { %1116 = vmatprep.subr.bf16.mxu1 %v1266_v27 }
 0x141   :  { %1118 = vmatpush3.bf16.msra.mxu1 %v1117_v31 }
 0x142   :  { %1119 = vmatprep.subr.bf16.mxu1 %v1266_v27 }
 0x145   :  { %1121 = vmatpush3.bf16.msra.mxu1 %v1120_v45 }
 0x146   :  { %1122 = vmatprep.subr.bf16.mxu1 %v1266_v27 }
 0x149   :  { %1124 = vmatpush3.bf16.msra.mxu1 %v1123_v34 }
 0x14a   :  { %1125 = vmatprep.subr.bf16.mxu1 %v1266_v27  ;;  %v2005_v27 = vld [vmem:[%s2056_s4 + $0x8] sm:$0xff] }
 0x14d   :  { %1127 = vmatpush3.bf16.msra.mxu1 %v1126_v23 }
 0x1cc   :  { %v704_v42 = vpop.f32.mrb[0].mxu0 }
 0x1cd   :  { %v705_v39 = vadd.f32 %v1993_v38, %v704_v42  ;;  %v706_v49 = vpop.f32.mrb[1].mxu0 }
 0x1cf   :  { %v783_v40 = vmax.f32 %v705_v39, 0.0 }
 0x1d0   :  { %v709_v53 = vpop.f32.mrb[2].mxu0 }
 0x1d1   :  { %v710_v46 = vadd.f32 %v1993_v38, %v709_v53  ;;  %v711_v47 = vpop.f32.mrb[3].mxu0  ;;  %v801_v8 = vadd.f32 %v2000_v0, %v783_v40 }
 0x1d3   :  { %v784_v6 = vmax.f32 %v710_v46, 0.0 }
 0x1d4   :  { %v714_v44 = vpop.f32.mrb[4].mxu0 }
 0x1d5   :  { %v802_v48 = vadd.f32 %v2005_v27, %v784_v6  ;;  %v715_v51 = vadd.f32 %v1993_v38, %v714_v44  ;;  %v716_v14 = vpop.f32.mrb[5].mxu0 }
 0x1d7   :  { %v817_v52 = vmax.f32 %v801_v8, %v802_v48  ;;  %v785_v22 = vmax.f32 %v715_v51, 0.0 }
 0x1d8   :  { %v719_v54 = vpop.f32.mrb[6].mxu0 }
 0x1d9   :  { %v818_v55 = vrot.slane %v817_v52, 4  ;;  %v720_v56 = vadd.f32 %v1993_v38, %v719_v54  ;;  %v721_v10 = vpop.f32.mrb[7].mxu0  ;;  %v803_v50 = vadd.f32 %v2000_v0, %v785_v22 }
 0x1db   :  { %v819_v57 = vmax.f32 %v817_v52, %v818_v55  ;;  %v786_v58 = vmax.f32 %v720_v56, 0.0 }
 0x1dc   :  { %v724_v43 = vpop.f32.mrb[8].mxu0 }
 0x1dd   :  { %v804_v20 = vadd.f32 %v2005_v27, %v786_v58  ;;  %v725_v5 = vadd.f32 %v1993_v38, %v724_v43  ;;  %v726_v9 = vpop.f32.mrb[9].mxu0  ;;  %v820_v59 = vrot.slane %v819_v57, 2 }
 0x1df   :  { %v824_v26 = vmax.f32 %v803_v50, %v804_v20  ;;  %v787_v15 = vmax.f32 %v725_v5, 0.0  ;;  %v821_v3 = vmax.f32 %v819_v57, %v820_v59 }
 0x1e0   :  { %v729_v1 = vpop.f32.mrb[10].mxu0 }
 0x1e1   :  { %v825_v60 = vrot.slane %v824_v26, 4  ;;  %v730_v4 = vadd.f32 %v1993_v38, %v729_v1  ;;  %v731_v63 = vpop.f32.mrb[11].mxu0  ;;  %v805_v61 = vadd.f32 %v2000_v0, %v787_v15  ;;  %v822_v41 = vrot.slane %v821_v3, 1 }
 0x1e3   :  { %v826_v28 = vmax.f32 %v824_v26, %v825_v60  ;;  %v788_v12 = vmax.f32 %v730_v4, 0.0  ;;  %v823_v31 = vmax.f32 %v821_v3, %v822_v41 }
 0x1e4   :  { %v734_v11 = vpop.f32.mrb[12].mxu0 }
 0x1e5   :  { %v827_v35 = vrot.slane %v826_v28, 2  ;;  %v806_v19 = vadd.f32 %v2005_v27, %v788_v12  ;;  %v735_v16 = vadd.f32 %v1993_v38, %v734_v11  ;;  %v736_v17 = vpop.f32.mrb[13].mxu0 }
 0x1e7   :  { %v828_v18 = vmax.f32 %v826_v28, %v827_v35  ;;  %v831_v24 = vmax.f32 %v805_v61, %v806_v19  ;;  %v789_v21 = vmax.f32 %v735_v16, 0.0 }
 0x1e8   :  { %v739_v25 = vpop.f32.mrb[14].mxu0 }
 0x1e9   :  { %v829_v2 = vrot.slane %v828_v18, 1  ;;  %v832_v7 = vrot.slane %v831_v24, 4  ;;  %v740_v29 = vadd.f32 %v1993_v38, %v739_v25  ;;  %v741_v30 = vpop.f32.mrb[15].mxu0  ;;  %v807_v33 = vadd.f32 %v2000_v0, %v789_v21 }
 0x1eb   :  { %v830_v13 = vmax.f32 %v828_v18, %v829_v2  ;;  %v833_v32 = vmax.f32 %v831_v24, %v832_v7  ;;  %v790_v45 = vmax.f32 %v740_v29, 0.0 }
 0x1ec   :  { %v744_v62 = vpop.f32.mrb[16].mxu0 }
 0x1ed   :  { %v834_v34 = vrot.slane %v833_v32, 2  ;;  %v808_v36 = vadd.f32 %v2005_v27, %v790_v45  ;;  %v745_v37 = vadd.f32 %v1993_v38, %v744_v62  ;;  %v746_v23 = vpop.f32.mrb[17].mxu0  ;;  %v905_v42 = vsel %vm904_vm9, %v830_v13, %v823_v31 }
 0x1ef   :  { %v835_v39 = vmax.f32 %v833_v32, %v834_v34  ;;  %v838_v49 = vmax.f32 %v807_v33, %v808_v36  ;;  %v791_v53 = vmax.f32 %v745_v37, 0.0 }
 0x1f0   :  { %v749_v40 = vpop.f32.mrb[18].mxu0 }
 0x1f1   :  { %v836_v46 = vrot.slane %v835_v39, 1  ;;  %v839_v47 = vrot.slane %v838_v49, 4  ;;  %v750_v6 = vadd.f32 %v1993_v38, %v749_v40  ;;  %v751_v44 = vpop.f32.mrb[19].mxu0  ;;  %v809_v14 = vadd.f32 %v2000_v0, %v791_v53 }
 0x1f3   :  { %v837_v8 = vmax.f32 %v835_v39, %v836_v46  ;;  %v840_v48 = vmax.f32 %v838_v49, %v839_v47  ;;  %v792_v51 = vmax.f32 %v750_v6, 0.0 }
 0x1f4   :  { %v754_v52 = vpop.f32.mrb[20].mxu0 }
 0x1f5   :  { %v841_v54 = vrot.slane %v840_v48, 2  ;;  %v810_v55 = vadd.f32 %v2005_v27, %v792_v51  ;;  %v755_v22 = vadd.f32 %v1993_v38, %v754_v52  ;;  %v756_v56 = vpop.f32.mrb[21].mxu0  ;;  %v907_v10 = vsel %vm906_vm10, %v837_v8, %v905_v42 }
 0x1f7   :  { %v842_v57 = vmax.f32 %v840_v48, %v841_v54  ;;  %v845_v58 = vmax.f32 %v809_v14, %v810_v55  ;;  %v793_v43 = vmax.f32 %v755_v22, 0.0 }
 0x1f8   :  { %v759_v50 = vpop.f32.mrb[22].mxu0 }
 0x1f9   :  { %v843_v20 = vrot.slane %v842_v57, 1  ;;  %v846_v5 = vrot.slane %v845_v58, 4  ;;  %v760_v9 = vadd.f32 %v1993_v38, %v759_v50  ;;  %v761_v59 = vpop.f32.mrb[23].mxu0  ;;  %v811_v15 = vadd.f32 %v2000_v0, %v793_v43 }
 0x1fb   :  { %v844_v26 = vmax.f32 %v842_v57, %v843_v20  ;;  %v847_v1 = vmax.f32 %v845_v58, %v846_v5  ;;  %v794_v60 = vmax.f32 %v760_v9, 0.0 }
 0x1fc   :  { %v764_v4 = vpop.f32.mrb[24].mxu0 }
 0x1fd   :  { %v848_v63 = vrot.slane %v847_v1, 2  ;;  %v812_v3 = vadd.f32 %v2005_v27, %v794_v60  ;;  %v765_v28 = vadd.f32 %v1993_v38, %v764_v4  ;;  %v766_v12 = vpop.f32.mrb[25].mxu0  ;;  %v909_v11 = vsel %vm908_vm11, %v844_v26, %v907_v10 }
 0x1ff   :  { %v849_v35 = vmax.f32 %v847_v1, %v848_v63  ;;  %v852_v61 = vmax.f32 %v811_v15, %v812_v3  ;;  %v795_v19 = vmax.f32 %v765_v28, 0.0 }
 0x200   :  { %v769_v16 = vpop.f32.mrb[26].mxu0 }
 0x201   :  { %v850_v17 = vrot.slane %v849_v35, 1  ;;  %v853_v41 = vrot.slane %v852_v61, 4  ;;  %v770_v18 = vadd.f32 %v1993_v38, %v769_v16  ;;  %v771_v24 = vpop.f32.mrb[27].mxu0  ;;  %v813_v7 = vadd.f32 %v2000_v0, %v795_v19 }
 0x203   :  { %v851_v21 = vmax.f32 %v849_v35, %v850_v17  ;;  %v854_v25 = vmax.f32 %v852_v61, %v853_v41  ;;  %v796_v2 = vmax.f32 %v770_v18, 0.0 }
 0x204   :  { %v774_v29 = vpop.f32.mrb[28].mxu0 }
 0x205   :  { %v855_v30 = vrot.slane %v854_v25, 2  ;;  %v814_v31 = vadd.f32 %v2005_v27, %v796_v2  ;;  %v775_v13 = vadd.f32 %v1993_v38, %v774_v29  ;;  %v776_v32 = vpop.f32.mrb[29].mxu0  ;;  %v911_v45 = vsel %vm910_vm12, %v851_v21, %v909_v11 }
 0x207   :  { %v856_v33 = vmax.f32 %v854_v25, %v855_v30  ;;  %v859_v62 = vmax.f32 %v813_v7, %v814_v31  ;;  %v797_v23 = vmax.f32 %v775_v13, 0.0 }
 0x208   :  { %v779_v34 = vpop.f32.mrb[30].mxu0 }
 0x209   :  { %v857_v36 = vrot.slane %v856_v33, 1  ;;  %v860_v37 = vrot.slane %v859_v62, 4  ;;  %v780_v42 = vadd.f32 %v1993_v38, %v779_v34  ;;  %v781_v39 = vpop.f32.mrb[31].mxu0  ;;  %v815_v47 = vadd.f32 %v2000_v0, %v797_v23  ;;  %v1021_v0 = vld [vmem:[%s2058_s6] ss:$0 sm:$0xff] }
 0x20b   :  { %v861_v49 = vmax.f32 %v859_v62, %v860_v37  ;;  %v798_v53 = vmax.f32 %v780_v42, 0.0  ;;  %v858_v40 = vmax.f32 %v856_v33, %v857_v36 }
 0x20d   :  { %v862_v46 = vrot.slane %v861_v49, 2  ;;  %v816_v6 = vadd.f32 %v2005_v27, %v798_v53  ;;  %v913_v44 = vsel %vm912_vm13, %v858_v40, %v911_v45 }
 0x20f   :  { %v863_v8 = vmax.f32 %v861_v49, %v862_v46  ;;  %v866_v48 = vmax.f32 %v815_v47, %v816_v6 }
 0x211   :  { %v867_v51 = vrot.slane %v866_v48, 4  ;;  %v864_v14 = vrot.slane %v863_v8, 1 }
 0x213   :  { %v868_v52 = vmax.f32 %v866_v48, %v867_v51  ;;  %v865_v54 = vmax.f32 %v863_v8, %v864_v14 }
 0x215   :  { %v869_v55 = vrot.slane %v868_v52, 2  ;;  %v915_v38 = vsel %vm914_vm14, %v865_v54, %v913_v44 }
 0x217   :  { %v870_v22 = vmax.f32 %v868_v52, %v869_v55 }
 0x219   :  { %v871_v56 = vrot.slane %v870_v22, 1 }
 0x21b   :  { %v872_v10 = vmax.f32 %v870_v22, %v871_v56 }
 0x21d   :  { %v917_v57 = vsel %vm916_vm15, %v872_v10, %v915_v38 }
 0x21e   :  { %1072 = vmatmul.mubr.f32.vlgmr.msra.gmra.mrb[0].mxu1 %v917_v57 }
 0x2f1   :  { %v985_v27 = vpop.f32.mrb[0].mxu1 }
 0x2f2   :  { %v986_v58 = vadd.f32 %v1021_v0, %v985_v27  ;;  %v1073_v43 = vpop.f32.mrb[1].mxu1 }
 0x2f4   :  { %989 = vst [vmem:[#allocation2] sm:$0xff] %v986_v58 }
 0x2f5   :  { %1252 = shalt.err (!%p1249_p4)
}
 0x2f6   :  { %s1253_s13 = scalar_lea.hbm %s2059_s7, 128 }
 0x2f7   :  { %p1254_p5 = scmp.ne.s32.totalorder %s2059_s7, %s1253_s13  ;;  %p1257_p6 = scmp.lt.u32.totalorder %s1253_s13, %s2059_s7 }
 0x2f9   :  { %p1259_p7 = pnand %p1257_p6, %p1254_p5 }
 0x2fb   :  { %1262 = shalt.err (!%p1259_p7)
}
 0x2fc   :  { %999 = dma.vmem_to_hbm [thread:$0]  %s997_s2, 128, %s2059_s7, [#allocation3]  }
 0x2fd   :  { %1263 = dma.done.wait [#allocation3], 128  }
 0x2fe   :  { %1264 = vsyncadd [#allocation3], 4294967168 }
 0x2ff   :  { %1003 = vsyncpa [#allocation3], 1 }

</bundles_post_ra>
